<compile_context>
chip_gen: v5e
topology: v5e:2x2
jax: 0.10.0
libtpu: 0.0.40
codegen_flags: <defaults>
</compile_context>

<pallas_src>
import jax
import jax.numpy as jnp
from jax.experimental import pallas as pl
from jax.experimental.pallas import tpu as pltpu

_MAX_DMA_CHUNKS = 4          # a few outstanding DMAs is enough to fill HBM BW
_MIN_CHUNK_BYTES = 1 << 20   # never split below ~1 MiB per chunk


def _chunk_bounds(leading, bytes_per_row):
    """Static (start, size) chunks along the leading dim, each >= 1 MiB."""
    total_bytes = leading * bytes_per_row
    if leading < 2 or total_bytes < 2 * _MIN_CHUNK_BYTES:
        return [(0, leading)]
    n_chunks = int(min(_MAX_DMA_CHUNKS, leading, total_bytes // _MIN_CHUNK_BYTES))
    n_chunks = max(1, n_chunks)
    base, rem = divmod(leading, n_chunks)
    bounds, start = [], 0
    for c in range(n_chunks):
        size = base + (1 if c < rem else 0)
        bounds.append((start, size))
        start += size
    return bounds


def _make_identity_dma_kernel(bounds):
    """Build a kernel that copies x (HBM) -> o (HBM) with len(bounds) DMAs."""
    if len(bounds) == 1:
        def kernel(x_hbm, o_hbm, sems):
            cp = pltpu.make_async_copy(x_hbm, o_hbm, sems.at[0])
            cp.start()
            cp.wait()
        return kernel

    def kernel(x_hbm, o_hbm, sems):
        copies = []
        # Static Python unroll: start every chunk's DMA, then wait on all of
        # them, so the copies overlap and keep the HBM pipe full.
        for idx, (start, size) in enumerate(bounds):
            cp = pltpu.make_async_copy(
                x_hbm.at[pl.ds(start, size)],
                o_hbm.at[pl.ds(start, size)],
                sems.at[idx],
            )
            cp.start()
            copies.append(cp)
        for cp in copies:
            cp.wait()
    return kernel


def dummy_model_forward(x):
    """Pallas implementation of DummyModel.forward (identity)."""
    if x.size == 0:
        # Nothing to copy; identity of an empty tensor is itself.
        return x

    orig_shape = x.shape
    xk = x.reshape(1) if x.ndim == 0 else x

    itemsize = jnp.dtype(xk.dtype).itemsize
    bytes_per_row = max(1, (xk.size // xk.shape[0]) * itemsize)
    bounds = _chunk_bounds(xk.shape[0], bytes_per_row)

    out = pl.pallas_call(
        _make_identity_dma_kernel(bounds),
        out_shape=jax.ShapeDtypeStruct(xk.shape, xk.dtype),
        in_specs=[pl.BlockSpec(memory_space=pl.ANY)],
        out_specs=pl.BlockSpec(memory_space=pl.ANY),
        scratch_shapes=[pltpu.SemaphoreType.DMA((len(bounds),))],
    )(xk)
    return out.reshape(orig_shape)


if __name__ == "__main__":
    key = jax.random.PRNGKey(0)
    # Primary example: small NCHW-like tensor.
    x = jax.random.normal(key, (2, 4, 16, 16), dtype=jnp.float32)
    y = jax.block_until_ready(dummy_model_forward(x))
    assert y.shape == x.shape and y.dtype == x.dtype
    assert bool(jnp.all(y == x))

    # Sub-32-bit dtype (bf16) — whole-ref DMA, no tiling/packing rules needed.
    x2 = jax.random.normal(jax.random.PRNGKey(1), (8, 4, 32, 128), dtype=jnp.bfloat16)
    y2 = jax.block_until_ready(dummy_model_forward(x2))
    assert y2.shape == x2.shape and y2.dtype == x2.dtype
    assert bool(jnp.all(y2 == x2))

    # Odd element count (not a multiple of 128): no pad/slice HBM passes.
    x3 = jax.random.normal(jax.random.PRNGKey(2), (3, 5, 7), dtype=jnp.float32)
    y3 = jax.block_until_ready(dummy_model_forward(x3))
    assert y3.shape == x3.shape and y3.dtype == x3.dtype
    assert bool(jnp.all(y3 == x3))

    # 2 MiB input: exercises the multi-chunk (overlapping-DMA) path.
    x4 = jax.random.normal(jax.random.PRNGKey(3), (8, 256, 256), dtype=jnp.float32)
    y4 = jax.block_until_ready(dummy_model_forward(x4))
    assert y4.shape == x4.shape and y4.dtype == x4.dtype
    assert bool(jnp.all(y4 == x4))

    print("KERNEL_OK")
</pallas_src>

<mosaic_0001>
module attributes {stable_mosaic.version = 11 : i64} {
  func.func @kernel(%arg0: memref<2x4x16x16xf32, #tpu.memory_space<any>>, %arg1: memref<2x4x16x16xf32, #tpu.memory_space<any>>, %arg2: memref<1x!tpu.dma_semaphore, #tpu.memory_space<semaphore_mem>>) attributes {dimension_semantics = [], scalar_prefetch = 0 : i64, scratch_operands = 1 : i64, tpu.core_type = #tpu.core_type<tc>} {
    %c0_i32 = arith.constant 0 : i32
    %0 = tpu.memref_slice %arg2[%c0_i32] : memref<1x!tpu.dma_semaphore, #tpu.memory_space<semaphore_mem>> -> memref<1x!tpu.dma_semaphore, #tpu.memory_space<semaphore_mem>>
    %1 = tpu.memref_squeeze %0 : memref<1x!tpu.dma_semaphore, #tpu.memory_space<semaphore_mem>> -> memref<!tpu.dma_semaphore, #tpu.memory_space<semaphore_mem>>
    tpu.enqueue_dma source(%arg0 : memref<2x4x16x16xf32, #tpu.memory_space<any>>) target(%arg1 : memref<2x4x16x16xf32, #tpu.memory_space<any>>) target_semaphore(%1 : memref<!tpu.dma_semaphore, #tpu.memory_space<semaphore_mem>>)
    %c0_i32_0 = arith.constant 0 : i32
    %2 = tpu.memref_slice %arg2[%c0_i32_0] : memref<1x!tpu.dma_semaphore, #tpu.memory_space<semaphore_mem>> -> memref<1x!tpu.dma_semaphore, #tpu.memory_space<semaphore_mem>>
    %3 = tpu.memref_squeeze %2 : memref<1x!tpu.dma_semaphore, #tpu.memory_space<semaphore_mem>> -> memref<!tpu.dma_semaphore, #tpu.memory_space<semaphore_mem>>
    tpu.wait_dma2 semaphore(%3 : memref<!tpu.dma_semaphore, #tpu.memory_space<semaphore_mem>>) src(%arg0 : memref<2x4x16x16xf32, #tpu.memory_space<any>>) dst(%arg1 : memref<2x4x16x16xf32, #tpu.memory_space<any>>)
    return
  }
}

</mosaic_0001>

<bundles_post_ra>
// kernel: tpu_custom_call.1
= control target key start
LH: loop header
LB: loop body
LE: loop exit
PB: predicated region body
PF: predicated region fallthrough
CT: control target
= control target key end

     0   :  { %s34_s12 = smov [#allocation2]   ;;  %s35_s13 = smov [#allocation3]   ;;  %s53_s0 = inlined_call_operand.hbm [shape: f32[2,4,16,16], index: 0, kind: input, shape index: {}]   ;;  %s54_s1 = inlined_call_operand.hbm [shape: f32[2,4,16,16], index: 1, kind: output, shape index: {}]  }
   0x1   :  { %s10_s8 = sshll.u32 %s53_s0, 4  ;;  %s12_s11 = sshll.u32 %s54_s1, 4  ;;  %s11_s8 = int_to_ptr.hbm [resolvable:$true] %s10_s8  ;;  %s13_s11 = int_to_ptr.hbm [resolvable:$true] %s12_s11 }
   0x2   :  { %s36_s14 = smov 0  }
   0x3   :  { %16 = dma.general %s11_s8, 2048, %s13_s11, %s34_s12, %s35_s13, [#allocation4], %s36_s14, 0  }
   0x4   :  { %32 = dma.done.wait [#allocation2], 2048 }
   0x5   :  { %33 = vsyncadd [#allocation2], 4294965248 }
   0x6   :  { %22 = vsyncmov [#allocation2] }
   0x9   :  { %s23_s15 = vpop.sfrf %22 }
   0xa   :  { %p28_p0 = scmp.ne.s32.totalorder %s23_s15, 0 }
   0xc   :  { %27 = shalt.err (%p28_p0)  }

</bundles_post_ra>
